<compile_context>
chip_gen: v7x
topology: tpu7x:2x2x1
jax: 0.10.0
libtpu: 0.0.40
codegen_flags: <defaults>
</compile_context>

<pallas_src>
import functools

import jax
import jax.numpy as jnp
from jax.experimental import pallas as pl
from jax.experimental.pallas import tpu as pltpu


def _fused_mlp_kernel(*refs, num_layers):
    """Fused MLP forward for one batch tile.

    refs = (x_ref, w0_ref, b0_ref, w1_ref, b1_ref, ..., o_ref)
      x_ref : (TB, att_size)
      w_i   : (in_i, out_i)    b_i : (1, out_i)
      o_ref : (TB, out_last)
    Intermediates never leave vregs/VMEM; only the final result is stored.
    """
    x_ref = refs[0]
    o_ref = refs[-1]
    wb_refs = refs[1:-1]

    h = x_ref[...].astype(jnp.float32)
    for i in range(num_layers):
        w = wb_refs[2 * i][...].astype(jnp.float32)
        b = wb_refs[2 * i + 1][...].astype(jnp.float32)  # (1, out_i) broadcasts
        h = jnp.dot(h, w, preferred_element_type=jnp.float32) + b
        if i + 1 < num_layers:  # LeakyReLU(0.2) between layers only
            h = jnp.where(h > 0, h, 0.2 * h)
    o_ref[...] = h.astype(o_ref.dtype)


def init_mapping_net_params(key, layer_sizes, att_size, dtype=jnp.float32):
    """Matches weights_init: W ~ N(0, 0.02), b = 0.  Bias stored as (1, Out)."""
    in_sizes = [att_size] + list(layer_sizes[:-1])
    params = []
    for in_size, out_size in zip(in_sizes, layer_sizes):
        key, wk = jax.random.split(key)
        w = (0.02 * jax.random.normal(wk, (in_size, out_size), jnp.float32)).astype(dtype)
        b = jnp.zeros((1, out_size), dtype=dtype)
        params.append((w, b))
    return params


def mapping_net_forward(params, s, *, batch_tile=256):
    """Single fused pallas_call for the whole MLP.

    Grid tiles only the batch dimension; weights/biases use constant index
    maps so they stay VMEM-resident across batch tiles.
    """
    B, in_size = s.shape
    num_layers = len(params)
    out_size = params[-1][0].shape[1]

    # Batch tile: full batch if small, otherwise an (8-aligned) tile.
    tb = B if B <= batch_tile else batch_tile
    grid = (pl.cdiv(B, tb),)

    vmem = pltpu.MemorySpace.VMEM
    in_specs = [pl.BlockSpec((tb, in_size), lambda i: (i, 0), memory_space=vmem)]
    flat_inputs = [s]
    for (w, b) in params:
        k_in, k_out = w.shape
        # Full-extent blocks for weights/biases -> always layout-legal, and the
        # constant index_map keeps them resident in VMEM across batch tiles.
        in_specs.append(pl.BlockSpec((k_in, k_out), lambda i: (0, 0), memory_space=vmem))
        in_specs.append(pl.BlockSpec((1, k_out), lambda i: (0, 0), memory_space=vmem))
        flat_inputs += [w, b]

    out_specs = pl.BlockSpec((tb, out_size), lambda i: (i, 0), memory_space=vmem)

    # Advisory cost estimate for XLA's scheduler.
    flops = 2 * B * sum(w.shape[0] * w.shape[1] for (w, _) in params)
    bytes_accessed = 4 * (s.size + B * out_size
                          + sum(w.size + b.size for (w, b) in params))
    cost = pl.CostEstimate(flops=flops, transcendentals=0,
                           bytes_accessed=bytes_accessed)

    kernel = functools.partial(_fused_mlp_kernel, num_layers=num_layers)
    return pl.pallas_call(
        kernel,
        out_shape=jax.ShapeDtypeStruct((B, out_size), s.dtype),
        grid=grid,
        in_specs=in_specs,
        out_specs=out_specs,
        compiler_params=pltpu.CompilerParams(dimension_semantics=("parallel",)),
        cost_estimate=cost,
    )(*flat_inputs)


if __name__ == "__main__":
    # Small shapes consistent with the module.
    batch = 8
    att_size = 32
    layer_sizes = [64, 32]

    key = jax.random.PRNGKey(0)
    ks, kp = jax.random.split(key)
    s = jax.random.normal(ks, (batch, att_size), dtype=jnp.float32)
    params = init_mapping_net_params(kp, layer_sizes, att_size)

    out = jax.block_until_ready(mapping_net_forward(params, s))

    # Pure-JAX reference of the same forward pass.
    h = s
    for i, (w, b) in enumerate(params):
        h = h @ w + b
        if i + 1 < len(params):
            h = jnp.where(h > 0, h, 0.2 * h)

    assert out.shape == (batch, layer_sizes[-1])
    assert bool(jnp.all(jnp.isfinite(out)))
    assert bool(jnp.allclose(out, h, atol=1e-5, rtol=1e-3))

    print("KERNEL_OK")
</pallas_src>

<mosaic_0001>
module attributes {stable_mosaic.version = 11 : i64} {
  func.func @_fused_mlp_kernel(%arg0: i32, %arg1: memref<8x32xf32, #tpu.memory_space<vmem>>, %arg2: memref<32x64xf32, #tpu.memory_space<vmem>>, %arg3: memref<1x64xf32, #tpu.memory_space<vmem>>, %arg4: memref<64x32xf32, #tpu.memory_space<vmem>>, %arg5: memref<1x32xf32, #tpu.memory_space<vmem>>, %arg6: memref<8x32xf32, #tpu.memory_space<vmem>>) attributes {dimension_semantics = [#tpu.dimension_semantics<parallel>], iteration_bounds = array<i64: 1>, scalar_prefetch = 0 : i64, scratch_operands = 0 : i64, tpu.core_type = #tpu.core_type<tc>, window_params = [{transform_indices = @transform_0, window_bounds = array<i64: 8, 32>}, {pipeline_mode = #tpu.pipeline_mode<synchronous>, transform_indices = @transform_1, window_bounds = array<i64: 32, 64>}, {pipeline_mode = #tpu.pipeline_mode<synchronous>, transform_indices = @transform_2, window_bounds = array<i64: 1, 64>}, {pipeline_mode = #tpu.pipeline_mode<synchronous>, transform_indices = @transform_3, window_bounds = array<i64: 64, 32>}, {pipeline_mode = #tpu.pipeline_mode<synchronous>, transform_indices = @transform_4, window_bounds = array<i64: 1, 32>}, {transform_indices = @transform_5, window_bounds = array<i64: 8, 32>}]} {
    %c0 = arith.constant 0 : index
    %c0_0 = arith.constant 0 : index
    %0 = vector.load %arg1[%c0, %c0_0] : memref<8x32xf32, #tpu.memory_space<vmem>>, vector<8x32xf32>
    %c0_1 = arith.constant 0 : index
    %c0_2 = arith.constant 0 : index
    %1 = vector.load %arg2[%c0_1, %c0_2] : memref<32x64xf32, #tpu.memory_space<vmem>>, vector<32x64xf32>
    %c0_3 = arith.constant 0 : index
    %c0_4 = arith.constant 0 : index
    %2 = vector.load %arg3[%c0_3, %c0_4] : memref<1x64xf32, #tpu.memory_space<vmem>>, vector<1x64xf32>
    %cst = arith.constant dense<0.000000e+00> : vector<8x64xf32>
    %3 = tpu.matmul %0, %1, %cst {dimension_numbers = #tpu.dot_dimension_numbers<[1], [0], [0], [1], [0, 0, 1, 1], [], []>} : vector<8x32xf32>, vector<32x64xf32>, vector<8x64xf32> -> vector<8x64xf32>
    %4 = vector.broadcast %2 : vector<1x64xf32> to vector<8x64xf32>
    %5 = arith.addf %3, %4 : vector<8x64xf32>
    %cst_5 = arith.constant 0.000000e+00 : f32
    %6 = vector.broadcast %cst_5 : f32 to vector<8x64xf32>
    %7 = arith.cmpf ogt, %5, %6 : vector<8x64xf32>
    %cst_6 = arith.constant 2.000000e-01 : f32
    %8 = vector.broadcast %cst_6 : f32 to vector<8x64xf32>
    %9 = arith.mulf %8, %5 : vector<8x64xf32>
    %10 = arith.select %7, %5, %9 : vector<8x64xi1>, vector<8x64xf32>
    %c0_7 = arith.constant 0 : index
    %c0_8 = arith.constant 0 : index
    %11 = vector.load %arg4[%c0_7, %c0_8] : memref<64x32xf32, #tpu.memory_space<vmem>>, vector<64x32xf32>
    %c0_9 = arith.constant 0 : index
    %c0_10 = arith.constant 0 : index
    %12 = vector.load %arg5[%c0_9, %c0_10] : memref<1x32xf32, #tpu.memory_space<vmem>>, vector<1x32xf32>
    %cst_11 = arith.constant dense<0.000000e+00> : vector<8x32xf32>
    %13 = tpu.matmul %10, %11, %cst_11 {dimension_numbers = #tpu.dot_dimension_numbers<[1], [0], [0], [1], [0, 0, 1, 1], [], []>} : vector<8x64xf32>, vector<64x32xf32>, vector<8x32xf32> -> vector<8x32xf32>
    %14 = vector.broadcast %12 : vector<1x32xf32> to vector<8x32xf32>
    %15 = arith.addf %13, %14 : vector<8x32xf32>
    %c0_12 = arith.constant 0 : index
    %c0_13 = arith.constant 0 : index
    %16 = vector.load %arg6[%c0_12, %c0_13] : memref<8x32xf32, #tpu.memory_space<vmem>>, vector<8x32xf32>
    tpu.vector_store %arg6[%c0_12, %c0_13], %15 {strides = array<i32>} : memref<8x32xf32, #tpu.memory_space<vmem>>, vector<8x32xf32>,
    return
  }
  func.func @transform_0(%arg0: i32) -> (i32, i32) {
    %c0_i32 = arith.constant 0 : i32
    %c0_i32_0 = arith.constant 0 : i32
    return %arg0, %c0_i32 : i32, i32
  }
  func.func @transform_1(%arg0: i32) -> (i32, i32) {
    %c0_i32 = arith.constant 0 : i32
    %c0_i32_0 = arith.constant 0 : i32
    %c0_i32_1 = arith.constant 0 : i32
    return %c0_i32, %c0_i32_0 : i32, i32
  }
  func.func @transform_2(%arg0: i32) -> (i32, i32) {
    %c0_i32 = arith.constant 0 : i32
    %c0_i32_0 = arith.constant 0 : i32
    %c0_i32_1 = arith.constant 0 : i32
    return %c0_i32, %c0_i32_0 : i32, i32
  }
  func.func @transform_3(%arg0: i32) -> (i32, i32) {
    %c0_i32 = arith.constant 0 : i32
    %c0_i32_0 = arith.constant 0 : i32
    %c0_i32_1 = arith.constant 0 : i32
    return %c0_i32, %c0_i32_0 : i32, i32
  }
  func.func @transform_4(%arg0: i32) -> (i32, i32) {
    %c0_i32 = arith.constant 0 : i32
    %c0_i32_0 = arith.constant 0 : i32
    %c0_i32_1 = arith.constant 0 : i32
    return %c0_i32, %c0_i32_0 : i32, i32
  }
  func.func @transform_5(%arg0: i32) -> (i32, i32) {
    %c0_i32 = arith.constant 0 : i32
    %c0_i32_0 = arith.constant 0 : i32
    return %arg0, %c0_i32 : i32, i32
  }
}

</mosaic_0001>

<bundles_post_ra>
// kernel: tpu_custom_call.1
= control target key start
LH: loop header
LB: loop body
LE: loop exit
PB: predicated region body
PF: predicated region fallthrough
CT: control target
= control target key end

     0   :  { %v308_v3 = vmov 0.0|0.0   ;;  %vm309_vm0 = vmmov 0   ;;  %v310_v6 = vmov 0.0   ;;  %s401_s0 = inlined_call_operand.vmem [shape: f32[8,32], index: 0, kind: input, shape index: {}]   ;;  %s402_s1 = inlined_call_operand.vmem [shape: f32[32,64], index: 1, kind: input, shape index: {}]   ;;  %s403_s2 = inlined_call_operand.vmem [shape: f32[1,64], index: 2, kind: input, shape index: {}]   ;;  %s404_s3 = inlined_call_operand.vmem [shape: f32[64,32], index: 3, kind: input, shape index: {}]   ;;  %s405_s4 = inlined_call_operand.vmem [shape: f32[1,32], index: 4, kind: input, shape index: {}]   ;;  %s406_s5 = inlined_call_operand.hbm [shape: f32[8,32], index: 5, kind: output, shape index: {}]  }
   0x1   :  { %v22_v0 = vld [vmem:[%s402_s1] sm:$0xff]  ;;  %v23_v1 = vld [vmem:[%s402_s1 + $0x8] sm:$0xff]  ;;  %v24_v2 = vld [vmem:[%s402_s1 + $0x10] sm:$0xff]  ;;  %262 = vmatprep.subr.bf16.mxu0 %v308_v3  ;;  %240 = vmatprep.mubr.msk.f32.mxu0 %vm309_vm0, %v310_v6 }
   0x2   :  { %v263_v4 = vpack.c.bf16 %v23_v1, %v22_v0  ;;  %v25_v5 = vld [vmem:[%s402_s1 + $0x18] sm:$0xff]  ;;  %v110_v7 = vld [vmem:[%s404_s3] sm:$0xff]  ;;  %268 = vmatprep.subr.bf16.mxu1 %v308_v3  ;;  %v111_v8 = vld [vmem:[%s404_s3 + $0x8] sm:$0xff]  ;;  %259 = vmatprep.mubr.msk.f32.mxu1 %vm309_vm0, %v310_v6 }
   0x3   :  { %v112_v9 = vld [vmem:[%s404_s3 + $0x10] sm:$0xff]  ;;  %v113_v10 = vld [vmem:[%s404_s3 + $0x18] sm:$0xff]  ;;  %v266_v11 = vpack.c.bf16 %v25_v5, %v24_v2  ;;  %v269_v12 = vpack.c.bf16 %v111_v8, %v110_v7 }
   0x4   :  { %264 = vmatpush3.bf16.msra.mxu0 %v263_v4 }
   0x5   :  { %265 = vmatprep.subr.bf16.mxu0 %v308_v3 }
   0x6   :  { %10 = vsyncpa [#allocation3], 0  ;;  %270 = vmatpush3.bf16.msra.mxu1 %v269_v12  ;;  %v272_v13 = vpack.c.bf16 %v113_v10, %v112_v9  ;;  %v114_v14 = vld [vmem:[%s404_s3 + $0x20] sm:$0xff]  ;;  %v115_v15 = vld [vmem:[%s404_s3 + $0x28] sm:$0xff]  ;;  %vm33_vm1 = vcmask 261120   ;;  %vm125_vm3 = vcmask 523264  }
   0x7   :  { %271 = vmatprep.subr.bf16.mxu1 %v308_v3  ;;  %v21_v16 = vld [vmem:[%s401_s0] sm:$0xff]  ;;  %v275_v17 = vpack.c.bf16 %v115_v15, %v114_v14  ;;  %v116_v18 = vld [vmem:[%s404_s3 + $0x30] sm:$0xff]  ;;  %v117_v19 = vld [vmem:[%s404_s3 + $0x38] sm:$0xff]  ;;  %s311_s21 = smov [#allocation2]  }
   0x8   :  { %267 = vmatpush3.bf16.msra.mxu0 %v266_v11  ;;  %v278_v20 = vpack.c.bf16 %v117_v19, %v116_v18  ;;  %v214_v21 = vld [vmem:[%s403_s2] ss:$0 sm:$0xff]  ;;  %s206_s3 = sshll.u32 %s311_s21, 4  ;;  %s207_s3 = int_to_ptr.vmem [resolvable:$true] %s206_s3 }
   0x9   :  { %v216_v27 = vld [vmem:[%s405_s4] ss:$0 sm:$0xff]  ;;  %s284_s2 = scalar_lea.vmem %s207_s3, 128  ;;  %p289_p1 = scmp.lt.s32.totalorder %s207_s3, %s207_s3 }
   0xa   :  { %273 = vmatpush3.bf16.msra.mxu1 %v272_v13  ;;  %p285_p0 = scmp.ne.s32.totalorder %s207_s3, %s284_s2  ;;  %p290_p2 = scmp.lt.s32.totalorder %s284_s2, %s284_s2 }
   0xb   :  { %241 = vmatmul.mubr.msk.f32.vlgmr.msra.gmra.mrb[0].mxu0 %vm33_vm1, %v21_v16  ;;  %274 = vmatprep.subr.bf16.mxu1 %v308_v3 }
   0xc   :  { %p291_p3 = por %p290_p2, %p289_p1 }
   0xe   :  { %276 = vmatpush3.bf16.msra.mxu1 %v275_v17  ;;  %p292_p4 = pnand %p291_p3, %p285_p0 }
   0xf   :  { %277 = vmatprep.subr.bf16.mxu1 %v308_v3 }
  0x12   :  { %279 = vmatpush3.bf16.msra.mxu1 %v278_v20 }
  0xde   :  { %v103_v22 = vpop.f32.mrb[0].mxu0 }
  0xdf   :  { %v104_v23 = vadd.f32 %v214_v21, %v103_v22  ;;  %v242_v24 = vpop.f32.mrb[1].mxu0 }
  0xe1   :  { %vm107_vm2 = vcmp.gt.f32.partialorder %v104_v23, 0.0  ;;  %v108_v25 = vmul.f32 0.2, %v104_v23 }
  0xe3   :  { %v109_v26 = vsel %vm107_vm2, %v104_v23, %v108_v25 }
  0xe4   :  { %260 = vmatmul.mubr.msk.f32.vlgmr.msra.gmra.mrb[0].mxu1 %vm125_vm3, %v109_v26 }
 0x1b7   :  { %v195_v28 = vpop.f32.mrb[0].mxu1 }
 0x1b8   :  { %v196_v29 = vadd.f32 %v216_v27, %v195_v28  ;;  %v261_v30 = vpop.f32.mrb[1].mxu1 }
 0x1ba   :  { %199 = vst.msk [vmem:[#allocation2] sm:$0xff] %vm33_vm1, %v196_v29 }
 0x1bb   :  { %295 = shalt.err (!%p292_p4)
}
 0x1bc   :  { %s296_s24 = scalar_lea.hbm %s406_s5, 128 }
 0x1bd   :  { %p297_p5 = scmp.ne.s32.totalorder %s406_s5, %s296_s24  ;;  %p300_p6 = scmp.lt.u32.totalorder %s296_s24, %s406_s5 }
 0x1bf   :  { %p302_p7 = pnand %p300_p6, %p297_p5 }
 0x1c1   :  { %305 = shalt.err (!%p302_p7)
}
 0x1c2   :  { %209 = dma.vmem_to_hbm [thread:$0]  %s207_s3, 128, %s406_s5, [#allocation3]  }
 0x1c3   :  { %306 = dma.done.wait [#allocation3], 128  }
 0x1c4   :  { %307 = vsyncadd [#allocation3], 4294967168 }
 0x1c5   :  { %213 = vsyncpa [#allocation3], 1 }

</bundles_post_ra>
